<compile_context>
chip_gen: v5e
topology: v5e:2x2
jax: 0.10.0
libtpu: 0.0.40
codegen_flags: <defaults>
</compile_context>

<pallas_src>
import functools

import jax
import jax.numpy as jnp
from jax import lax
from jax.experimental import pallas as pl
from jax.experimental.pallas import tpu as pltpu

F_IN, F_HID, F_OUT = 24, 48, 24
FPAD = 128  # lane-dense padded feature width


def _round_up(x, m):
    return ((x + m - 1) // m) * m


def _vmem_limit_bytes():
    cap = 64 * 1024 * 1024
    try:
        cap = int(getattr(pltpu.get_tpu_info(), "vmem_capacity_bytes", cap))
    except Exception:
        pass
    cap = max(cap, 64 * 1024 * 1024)
    return (cap // 4) * 3  # ~96 MiB on v5e/v6e (128 MiB), ~48 MiB on v7x (64 MiB)


def _pick_row_tile(n_pad, vmem_limit):
    """Largest row tile that divides n_pad, keeps >=2 tiles (v7x megacore) and fits VMEM."""
    if n_pad <= 128:
        return n_pad
    resident = 2 * (n_pad * FPAD * 2) + 4 * FPAD * FPAD * 4  # double-buffered bf16 X/t + weights
    for tm in (1024, 512, 256, 128):
        if n_pad % tm != 0 or n_pad // tm < 2:
            continue
        a_bufs = 2 * tm * n_pad                      # double-buffered int8 A row tile
        y_bufs = 2 * tm * FPAD * 4 + 2 * tm * FPAD * 2
        if resident + a_bufs + y_bufs <= (vmem_limit * 3) // 5:
            return tm
    return 128


# --------------------------------------------------------------------------
# Fused path (A fully VMEM-resident): one kernel, A read from HBM exactly once.
# --------------------------------------------------------------------------
def _fused_kernel(a_ref, x_ref, w1_ref, b1_ref, w2_ref, b2_ref, o_ref, *, n_valid):
    a = a_ref[...].astype(jnp.bfloat16)                                    # int8 {0,1} -> bf16, exact
    agg = jnp.dot(a, x_ref[...], preferred_element_type=jnp.float32)      # A @ X
    h1 = jnp.dot(agg, w1_ref[...], preferred_element_type=jnp.float32) + b1_ref[...]
    h1 = jnp.maximum(h1, 0.0)                                              # layer1 + relu
    t = jnp.dot(h1, w2_ref[...], preferred_element_type=jnp.float32)      # layer2 reassociated
    y = jnp.dot(a, t.astype(jnp.bfloat16), preferred_element_type=jnp.float32) + b2_ref[...]
    # global standardization over the valid [n_valid, F_OUT] region only (torch.std: ddof=1)
    rows = lax.broadcasted_iota(jnp.int32, y.shape, 0)
    cols = lax.broadcasted_iota(jnp.int32, y.shape, 1)
    valid = (rows < n_valid) & (cols < F_OUT)
    cnt = n_valid * F_OUT
    mean = jnp.sum(jnp.where(valid, y, 0.0)) / cnt
    c = jnp.where(valid, y - mean, 0.0)
    var = jnp.sum(c * c) / (cnt - 1)
    o_ref[...] = (y - mean) * lax.rsqrt(var)       # lane-dense store; pads sliced off in wrapper


# --------------------------------------------------------------------------
# Streaming path (row-tiled A grid) for graphs too large for the fused path.
# --------------------------------------------------------------------------
def _pass1_kernel(a_ref, x_ref, w1_ref, b1_ref, w2_ref, t_ref):
    a = a_ref[...].astype(jnp.bfloat16)
    agg = jnp.dot(a, x_ref[...], preferred_element_type=jnp.float32)
    h1 = jnp.maximum(
        jnp.dot(agg, w1_ref[...], preferred_element_type=jnp.float32) + b1_ref[...], 0.0)
    # layer-2 reassociation: t = h1 @ W2, emitted bf16 (halves t's HBM roundtrip / residency)
    t_ref[...] = jnp.dot(h1, w2_ref[...], preferred_element_type=jnp.float32).astype(jnp.bfloat16)


def _pass2_kernel(a_ref, t_ref, b2_ref, y_ref):
    a = a_ref[...].astype(jnp.bfloat16)
    y_ref[...] = jnp.dot(a, t_ref[...], preferred_element_type=jnp.float32) + b2_ref[...]


def _stats_kernel(y_ref, s_ref, *, n_valid, tm):
    # tiled sum / sum-of-squares reduction; output block is grid-resident (P3 accumulator)
    i = pl.program_id(0)

    @pl.when(i == 0)
    def _():
        s_ref[...] = jnp.zeros_like(s_ref)

    y = y_ref[...]
    rows = lax.broadcasted_iota(jnp.int32, y.shape, 0) + i * tm
    cols = lax.broadcasted_iota(jnp.int32, y.shape, 1)
    ym = jnp.where((rows < n_valid) & (cols < F_OUT), y, 0.0)
    lane = lax.broadcasted_iota(jnp.int32, s_ref.shape, 1)
    part = jnp.where(lane == 0, jnp.sum(ym),
                     jnp.where(lane == 1, jnp.sum(ym * ym), 0.0))
    s_ref[...] += part


def _normalize_kernel(y_ref, mean_ref, rstd_ref, o_ref):
    o_ref[...] = (y_ref[...] - mean_ref[...]) * rstd_ref[...]


# --------------------------------------------------------------------------
# Wrappers
# --------------------------------------------------------------------------
def padded_nodes(n):
    return _round_up(max(n, 1), 128)


def pack_adjacency(adj, n_pad=None):
    """Pad and pack the dense 0/1 adjacency as int8 once (hoist for static graphs)."""
    n = adj.shape[0]
    if n_pad is None:
        n_pad = padded_nodes(n)
    return jnp.zeros((n_pad, n_pad), jnp.int8).at[:n, :n].set(adj.astype(jnp.int8))


def gcn_net_packed(a_pad, features, w1, b1, w2, b2, *, force_stream=False):
    n = features.shape[0]
    n_pad = a_pad.shape[0]
    vmem_limit = _vmem_limit_bytes()

    # Lane-dense (128-wide) padded operands; big tiles bf16, tiny weights f32.
    x_pad = jnp.zeros((n_pad, FPAD), jnp.bfloat16).at[:n, :F_IN].set(features.astype(jnp.bfloat16))
    w1_pad = jnp.zeros((FPAD, FPAD), jnp.float32).at[:F_IN, :F_HID].set(w1)
    b1_pad = jnp.zeros((1, FPAD), jnp.float32).at[:, :F_HID].set(jnp.reshape(b1, (1, -1)))
    w2_pad = jnp.zeros((FPAD, FPAD), jnp.float32).at[:F_HID, :F_OUT].set(w2)
    b2_pad = jnp.zeros((1, FPAD), jnp.float32).at[:, :F_OUT].set(jnp.reshape(b2, (1, -1)))

    # ---- fused single-kernel path: A read from HBM once, everything in VMEM ----
    fused_bytes = n_pad * n_pad + n_pad * FPAD * 2 + 4 * FPAD * FPAD * 4 + 6 * n_pad * FPAD * 4
    if (not force_stream) and fused_bytes <= vmem_limit // 2:
        vmem = pl.BlockSpec(memory_space=pltpu.MemorySpace.VMEM)
        out_pad = pl.pallas_call(
            functools.partial(_fused_kernel, n_valid=n),
            in_specs=[vmem] * 6,
            out_specs=vmem,
            out_shape=jax.ShapeDtypeStruct((n_pad, FPAD), jnp.float32),
            compiler_params=pltpu.CompilerParams(vmem_limit_bytes=vmem_limit),
        )(a_pad, x_pad, w1_pad, b1_pad, w2_pad, b2_pad)
        return out_pad[:n, :F_OUT]

    # ---- streaming path: row-tiled A grid (parallel), lane-dense outputs ----
    tm = _pick_row_tile(n_pad, vmem_limit)
    grid_m = n_pad // tm

    row_spec = pl.BlockSpec((tm, n_pad), lambda i: (i, 0))   # streamed int8 A row tile
    tile_spec = pl.BlockSpec((tm, FPAD), lambda i: (i, 0))   # lane-dense per-row-tile block

    def resident(shape):                                     # grid-invariant VMEM operand
        return pl.BlockSpec(shape, lambda i: (0,) * len(shape))

    par = pltpu.CompilerParams(dimension_semantics=("parallel",), vmem_limit_bytes=vmem_limit)
    arb = pltpu.CompilerParams(dimension_semantics=("arbitrary",), vmem_limit_bytes=vmem_limit)

    # pass 1: t = relu(A X W1 + b1) @ W2   (bf16 output)
    t_pad = pl.pallas_call(
        _pass1_kernel,
        grid=(grid_m,),
        in_specs=[row_spec, resident((n_pad, FPAD)), resident((FPAD, FPAD)),
                  resident((1, FPAD)), resident((FPAD, FPAD))],
        out_specs=tile_spec,
        out_shape=jax.ShapeDtypeStruct((n_pad, FPAD), jnp.bfloat16),
        compiler_params=par,
    )(a_pad, x_pad, w1_pad, b1_pad, w2_pad)

    # pass 2: y = A t + b2
    y_pad = pl.pallas_call(
        _pass2_kernel,
        grid=(grid_m,),
        in_specs=[row_spec, resident((n_pad, FPAD)), resident((1, FPAD))],
        out_specs=tile_spec,
        out_shape=jax.ShapeDtypeStruct((n_pad, FPAD), jnp.float32),
        compiler_params=par,
    )(a_pad, t_pad, b2_pad)

    # pass 3: tiled masked sum / sumsq reduction over the valid region
    stats = pl.pallas_call(
        functools.partial(_stats_kernel, n_valid=n, tm=tm),
        grid=(grid_m,),
        in_specs=[tile_spec],
        out_specs=pl.BlockSpec((8, 128), lambda i: (0, 0)),
        out_shape=jax.ShapeDtypeStruct((8, 128), jnp.float32),
        compiler_params=arb,
    )(y_pad)

    cnt = n * F_OUT
    total, totsq = stats[0, 0], stats[0, 1]
    mean = total / cnt
    var = (totsq - total * mean) / (cnt - 1)          # unbiased, like torch.std
    rstd = lax.rsqrt(var)
    mean_b = jnp.full((1, FPAD), mean, jnp.float32)
    rstd_b = jnp.full((1, FPAD), rstd, jnp.float32)

    # pass 4: row-tiled normalization
    out_pad = pl.pallas_call(
        _normalize_kernel,
        grid=(grid_m,),
        in_specs=[tile_spec, resident((1, FPAD)), resident((1, FPAD))],
        out_specs=tile_spec,
        out_shape=jax.ShapeDtypeStruct((n_pad, FPAD), jnp.float32),
        compiler_params=par,
    )(y_pad, mean_b, rstd_b)

    return out_pad[:n, :F_OUT]


def gcn_net(adj, features, w1, b1, w2, b2, *, force_stream=False):
    a_pad = pack_adjacency(adj)
    return gcn_net_packed(a_pad, features, w1, b1, w2, b2, force_stream=force_stream)


def init_params(key):
    # Synthetic parameters mirroring nn.Linear(24,48) / nn.Linear(48,24),
    # stored already transposed to (in_feats, out_feats).
    k1, k2, k3, k4 = jax.random.split(key, 4)
    w1 = jax.random.uniform(k1, (F_IN, F_HID), jnp.float32, -1.0, 1.0) / jnp.sqrt(24.0)
    b1 = jax.random.uniform(k2, (1, F_HID), jnp.float32, -1.0, 1.0) / jnp.sqrt(24.0)
    w2 = jax.random.uniform(k3, (F_HID, F_OUT), jnp.float32, -1.0, 1.0) / jnp.sqrt(48.0)
    b2 = jax.random.uniform(k4, (1, F_OUT), jnp.float32, -1.0, 1.0) / jnp.sqrt(48.0)
    return w1, b1, w2, b2


def reference(adj, x, w1, b1, w2, b2):
    h = jnp.maximum(adj @ x @ w1 + b1, 0.0)
    y = adj @ h @ w2 + b2
    mean = jnp.mean(y)
    std = jnp.sqrt(jnp.sum((y - mean) ** 2) / (y.size - 1))
    return (y - mean) / std


if __name__ == "__main__":
    key = jax.random.PRNGKey(0)
    k_f1, k_a1, k_p, k_f2, k_a2 = jax.random.split(key, 5)

    # Round parameters/features to bf16-representable values so the bf16 MXU
    # path and the f32 reference see identical inputs (keeps comparison tight).
    _bf16r = lambda a: a.astype(jnp.bfloat16).astype(jnp.float32)
    w1, b1, w2, b2 = map(_bf16r, init_params(k_p))

    # --- small graph: fully fused single-kernel (VMEM-resident) path ---
    n1 = 8
    x1 = _bf16r(jax.random.normal(k_f1, (n1, F_IN), jnp.float32))
    adj1 = (jax.random.uniform(k_a1, (n1, n1)) < 0.4).astype(jnp.float32)
    out1 = jax.block_until_ready(gcn_net(adj1, x1, w1, b1, w2, b2))
    ref1 = reference(adj1, x1, w1, b1, w2, b2)
    assert out1.shape == (n1, F_OUT)
    assert jnp.allclose(out1, ref1, atol=2e-2, rtol=2e-2), \
        float(jnp.max(jnp.abs(out1 - ref1)))

    # --- larger graph: row-tiled streaming path (multi-tile grid), packing hoisted ---
    n2 = 300
    x2 = _bf16r(jax.random.normal(k_f2, (n2, F_IN), jnp.float32))
    adj2 = (jax.random.uniform(k_a2, (n2, n2)) < 0.05).astype(jnp.float32)
    a2_pad = pack_adjacency(adj2)  # one-time packing for a static graph
    out2 = jax.block_until_ready(
        gcn_net_packed(a2_pad, x2, w1, b1, w2, b2, force_stream=True))
    ref2 = reference(adj2, x2, w1, b1, w2, b2)
    assert out2.shape == (n2, F_OUT)
    assert jnp.allclose(out2, ref2, atol=2e-2, rtol=2e-2), \
        float(jnp.max(jnp.abs(out2 - ref2)))

    print("KERNEL_OK")
</pallas_src>

<mosaic_0001>
module attributes {stable_mosaic.version = 11 : i64} {
  func.func @_fused_kernel(%arg0: memref<128x128xi8, #tpu.memory_space<vmem>>, %arg1: memref<128x128xbf16, #tpu.memory_space<vmem>>, %arg2: memref<128x128xf32, #tpu.memory_space<vmem>>, %arg3: memref<1x128xf32, #tpu.memory_space<vmem>>, %arg4: memref<128x128xf32, #tpu.memory_space<vmem>>, %arg5: memref<1x128xf32, #tpu.memory_space<vmem>>, %arg6: memref<128x128xf32, #tpu.memory_space<vmem>>) attributes {dimension_semantics = [], scalar_prefetch = 0 : i64, scratch_operands = 0 : i64, tpu.core_type = #tpu.core_type<tc>} {
    %c0 = arith.constant 0 : index
    %c0_0 = arith.constant 0 : index
    %0 = vector.load %arg0[%c0, %c0_0] : memref<128x128xi8, #tpu.memory_space<vmem>>, vector<128x128xi8>
    %1 = arith.sitofp %0 : vector<128x128xi8> to vector<128x128xbf16>
    %c0_1 = arith.constant 0 : index
    %c0_2 = arith.constant 0 : index
    %2 = vector.load %arg1[%c0_1, %c0_2] : memref<128x128xbf16, #tpu.memory_space<vmem>>, vector<128x128xbf16>
    %cst = arith.constant dense<0.000000e+00> : vector<128x128xf32>
    %3 = tpu.matmul %1, %2, %cst {dimension_numbers = #tpu.dot_dimension_numbers<[1], [0], [0], [1], [0, 0, 1, 1], [], []>} : vector<128x128xbf16>, vector<128x128xbf16>, vector<128x128xf32> -> vector<128x128xf32>
    %c0_3 = arith.constant 0 : index
    %c0_4 = arith.constant 0 : index
    %4 = vector.load %arg2[%c0_3, %c0_4] : memref<128x128xf32, #tpu.memory_space<vmem>>, vector<128x128xf32>
    %cst_5 = arith.constant dense<0.000000e+00> : vector<128x128xf32>
    %5 = tpu.matmul %3, %4, %cst_5 {dimension_numbers = #tpu.dot_dimension_numbers<[1], [0], [0], [1], [0, 0, 1, 1], [], []>} : vector<128x128xf32>, vector<128x128xf32>, vector<128x128xf32> -> vector<128x128xf32>
    %c0_6 = arith.constant 0 : index
    %c0_7 = arith.constant 0 : index
    %6 = vector.load %arg3[%c0_6, %c0_7] : memref<1x128xf32, #tpu.memory_space<vmem>>, vector<1x128xf32>
    %7 = vector.broadcast %6 : vector<1x128xf32> to vector<128x128xf32>
    %8 = arith.addf %5, %7 : vector<128x128xf32>
    %cst_8 = arith.constant 0.000000e+00 : f32
    %9 = vector.broadcast %cst_8 : f32 to vector<128x128xf32>
    %10 = arith.maximumf %8, %9 : vector<128x128xf32>
    %c0_9 = arith.constant 0 : index
    %c0_10 = arith.constant 0 : index
    %11 = vector.load %arg4[%c0_9, %c0_10] : memref<128x128xf32, #tpu.memory_space<vmem>>, vector<128x128xf32>
    %cst_11 = arith.constant dense<0.000000e+00> : vector<128x128xf32>
    %12 = tpu.matmul %10, %11, %cst_11 {dimension_numbers = #tpu.dot_dimension_numbers<[1], [0], [0], [1], [0, 0, 1, 1], [], []>} : vector<128x128xf32>, vector<128x128xf32>, vector<128x128xf32> -> vector<128x128xf32>
    %13 = arith.truncf %12 : vector<128x128xf32> to vector<128x128xbf16>
    %cst_12 = arith.constant dense<0.000000e+00> : vector<128x128xf32>
    %14 = tpu.matmul %1, %13, %cst_12 {dimension_numbers = #tpu.dot_dimension_numbers<[1], [0], [0], [1], [0, 0, 1, 1], [], []>} : vector<128x128xbf16>, vector<128x128xbf16>, vector<128x128xf32> -> vector<128x128xf32>
    %c0_13 = arith.constant 0 : index
    %c0_14 = arith.constant 0 : index
    %15 = vector.load %arg5[%c0_13, %c0_14] : memref<1x128xf32, #tpu.memory_space<vmem>>, vector<1x128xf32>
    %16 = vector.broadcast %15 : vector<1x128xf32> to vector<128x128xf32>
    %17 = arith.addf %14, %16 : vector<128x128xf32>
    %18 = tpu.iota {dimensions = array<i32: 0>} : vector<128x128xi32>
    %19 = tpu.iota {dimensions = array<i32: 1>} : vector<128x128xi32>
    %c8_i32 = arith.constant 8 : i32
    %20 = vector.broadcast %c8_i32 : i32 to vector<128x128xi32>
    %21 = arith.cmpi slt, %18, %20 : vector<128x128xi32>
    %c24_i32 = arith.constant 24 : i32
    %22 = vector.broadcast %c24_i32 : i32 to vector<128x128xi32>
    %23 = arith.cmpi slt, %19, %22 : vector<128x128xi32>
    %24 = arith.andi %21, %23 : vector<128x128xi1>
    %cst_15 = arith.constant 0.000000e+00 : f32
    %25 = vector.broadcast %cst_15 : f32 to vector<128x128xf32>
    %26 = arith.select %24, %17, %25 : vector<128x128xi1>, vector<128x128xf32>
    %27 = vector.shape_cast %26 : vector<128x128xf32> to vector<1x128x128xf32>
    %cst_16 = arith.constant dense<0.000000e+00> : vector<1xf32>
    %28 = vector.multi_reduction <add>, %27, %cst_16 [1, 2] : vector<1x128x128xf32> to vector<1xf32>
    %29 = vector.shape_cast %28 : vector<1xf32> to vector<1x1x1xf32>
    %30 = vector.extract %29[0, 0, 0] : f32 from vector<1x1x1xf32>
    %cst_17 = arith.constant 1.920000e+02 : f32
    %31 = arith.divf %30, %cst_17 : f32
    %32 = vector.broadcast %31 : f32 to vector<128x128xf32>
    %33 = arith.subf %17, %32 : vector<128x128xf32>
    %cst_18 = arith.constant 0.000000e+00 : f32
    %34 = vector.broadcast %cst_18 : f32 to vector<128x128xf32>
    %35 = arith.select %24, %33, %34 : vector<128x128xi1>, vector<128x128xf32>
    %36 = arith.mulf %35, %35 : vector<128x128xf32>
    %37 = vector.shape_cast %36 : vector<128x128xf32> to vector<1x128x128xf32>
    %cst_19 = arith.constant dense<0.000000e+00> : vector<1xf32>
    %38 = vector.multi_reduction <add>, %37, %cst_19 [1, 2] : vector<1x128x128xf32> to vector<1xf32>
    %39 = vector.shape_cast %38 : vector<1xf32> to vector<1x1x1xf32>
    %40 = vector.extract %39[0, 0, 0] : f32 from vector<1x1x1xf32>
    %cst_20 = arith.constant 1.910000e+02 : f32
    %41 = arith.divf %40, %cst_20 : f32
    %42 = vector.broadcast %31 : f32 to vector<128x128xf32>
    %43 = arith.subf %17, %42 : vector<128x128xf32>
    %44 = math.rsqrt %41 : f32
    %45 = vector.broadcast %44 : f32 to vector<128x128xf32>
    %46 = arith.mulf %43, %45 : vector<128x128xf32>
    %c0_21 = arith.constant 0 : index
    %c0_22 = arith.constant 0 : index
    %47 = vector.load %arg6[%c0_21, %c0_22] : memref<128x128xf32, #tpu.memory_space<vmem>>, vector<128x128xf32>
    tpu.vector_store %arg6[%c0_21, %c0_22], %46 {strides = array<i32>} : memref<128x128xf32, #tpu.memory_space<vmem>>, vector<128x128xf32>,
    return
  }
}

</mosaic_0001>

<bundles_post_ra>
// kernel: tpu_custom_call.1
= control target key start
LH: loop header
LB: loop body
LE: loop exit
PB: predicated region body
PF: predicated region fallthrough
CT: control target
= control target key end

     0   :  { %11 = vsyncpa [#allocation3], 0  ;;  %s1097_s0 = inlined_call_operand.hbm [shape: s8[128,128], index: 0, kind: input, shape index: {}]   ;;  %s1098_s1 = inlined_call_operand.hbm [shape: bf16[128,128], index: 1, kind: input, shape index: {}]   ;;  %s1099_s2 = inlined_call_operand.hbm [shape: f32[128,128], index: 2, kind: input, shape index: {}]   ;;  %s1100_s3 = inlined_call_operand.vmem [shape: f32[1,128], index: 3, kind: input, shape index: {}]   ;;  %s1101_s4 = inlined_call_operand.hbm [shape: f32[128,128], index: 4, kind: input, shape index: {}]   ;;  %s1102_s5 = inlined_call_operand.vmem [shape: f32[1,128], index: 5, kind: input, shape index: {}]   ;;  %s1103_s6 = inlined_call_operand.hbm [shape: f32[128,128], index: 6, kind: output, shape index: {}]  }
   0x1   :  { %12 = vsyncpa [#allocation6], 0 }
   0x2   :  { %13 = vsyncpa [#allocation9], 0  ;;  %s32_s23 = sshll.u32 %s1098_s1, 4  ;;  %s33_s23 = int_to_ptr.hbm [resolvable:$true] %s32_s23 }
   0x3   :  { %14 = vsyncpa [#allocation4], 0  ;;  %s933_s24 = smov [#allocation5]   ;;  %s19_s28 = sshll.u32 %s1097_s0, 4  ;;  %s20_s28 = int_to_ptr.hbm [resolvable:$true] %s19_s28 }
   0x4   :  { %s34_s25 = sshll.u32 %s933_s24, 4  ;;  %s934_s29 = smov 64   ;;  %s35_s25 = int_to_ptr.vmem [resolvable:$true] %s34_s25 }
   0x5   :  { %s935_s30 = smov 4   ;;  %s936_s7 = smov [#allocation2]  }
   0x6   :  { %40 = dma.hbm_to_vmem [thread:$0]  %s33_s23, 1024, %s35_s25, [#allocation6], %s934_s29, %s934_s29, %s935_s30  }
   0x7   :  { %s21_s8 = sshll.u32 %s936_s7, 4  ;;  %s937_s9 = smov 128   ;;  %s22_s8 = int_to_ptr.vmem [resolvable:$true] %s21_s8 }
   0x8   :  { %s938_s10 = smov 8   ;;  %s45_s12 = sshll.u32 %s1099_s2, 4  ;;  %s46_s12 = int_to_ptr.hbm [resolvable:$true] %s45_s12 }
   0x9   :  { %27 = dma.hbm_to_vmem [thread:$0]  %s20_s28, 512, %s22_s8, [#allocation3], %s937_s9, %s937_s9, %s938_s10  }
   0xa   :  { %s939_s13 = smov [#allocation7]   ;;  %s60_s16 = sshll.u32 %s1101_s4, 4  ;;  %s61_s16 = int_to_ptr.hbm [resolvable:$true] %s60_s16 }
   0xb   :  { %s47_s0 = sshll.u32 %s939_s13, 4  ;;  %s940_s17 = smov [#allocation8]   ;;  %s48_s0 = int_to_ptr.vmem [resolvable:$true] %s47_s0 }
   0xc   :  { %53 = dma.hbm_to_vmem [thread:$0]  %s46_s12, 2048, %s48_s0, [#allocation6], %s937_s9, %s937_s9, %s938_s10  }
   0xd   :  { %s62_s18 = sshll.u32 %s940_s17, 4  ;;  %s63_s18 = int_to_ptr.vmem [resolvable:$true] %s62_s18 }
   0xe   :  { %68 = dma.hbm_to_vmem [thread:$0]  %s61_s16, 2048, %s63_s18, [#allocation9], %s937_s9, %s937_s9, %s938_s10  }
   0xf   :  { %925 = dma.done.wait [#allocation3], 512  }
  0x10   :  { %926 = vsyncadd [#allocation3], 4294966784 }
  0x11   :  { %927 = dma.done.wait [#allocation6], 3072  }
  0x12   :  { %928 = vsyncadd [#allocation6], 4294964224 }
  0x13   :  { %929 = dma.done.wait [#allocation9], 2048  }
  0x14   :  { %930 = vsyncadd [#allocation9], 4294965248  ;;  %v775_v0 = vld [vmem:[#allocation5 + $0x38] sm:$0xff]  ;;  %v774_v1 = vld [vmem:[#allocation5 + $0x30] sm:$0xff]  ;;  %s943_s26 = smov [#allocation10]   ;;  %s721_s30 = sshll.u32 %s1103_s6, 4  ;;  %s722_s30 = int_to_ptr.hbm [resolvable:$true] %s721_s30 }
  0x15   :  { %195 = vmatpush.bf16.msra.mxu0 %v775_v0  ;;  %v773_v2 = vld [vmem:[#allocation5 + $0x28] sm:$0xff]  ;;  %v772_v3 = vld [vmem:[#allocation5 + $0x20] sm:$0xff]  ;;  %v771_v4 = vld [vmem:[#allocation5 + $0x18] sm:$0xff]  ;;  %s719_s27 = sshll.u32 %s943_s26, 4  ;;  %s720_s27 = int_to_ptr.vmem [resolvable:$true] %s719_s27 }
  0x16   :  { %v770_v5 = vld [vmem:[#allocation5 + $0x10] sm:$0xff]  ;;  %v87_v6 = vld [vmem:[#allocation2] sm:$0xff]  ;;  %v769_v9 = vld [vmem:[#allocation5 + $0x8] sm:$0xff] }
  0x17   :  { %v91_v7 = vunpack.c.0.s8 %v87_v6  ;;  %v92_v8 = vunpack.c.1.s8 %v87_v6  ;;  %v768_v12 = vld [vmem:[#allocation5] sm:$0xff]  ;;  %v93_v14 = vunpack.c.2.s8 %v87_v6  ;;  %v94_v15 = vunpack.c.3.s8 %v87_v6  ;;  %v88_v19 = vld [vmem:[#allocation2 + $0x8] sm:$0xff]  ;;  %v259_v30 = vld [vmem:[#allocation7 + $0x78] sm:$0xff] }
  0x18   :  { %v95_v20 = vunpack.c.0.s8 %v88_v19  ;;  %v96_v21 = vunpack.c.1.s8 %v88_v19  ;;  %v97_v25 = vunpack.c.2.s8 %v88_v19  ;;  %v98_v26 = vunpack.c.3.s8 %v88_v19  ;;  %v89_v31 = vld [vmem:[#allocation2 + $0x10] sm:$0xff]  ;;  %264 = vmatpush.msra.mxu1 %v259_v30  ;;  %v257_v38 = vld [vmem:[#allocation7 + $0x68] sm:$0xff]  ;;  %v256_v39 = vld [vmem:[#allocation7 + $0x60] sm:$0xff] }
  0x19   :  { %196 = vmatpush.bf16.msra.mxu0 %v774_v1  ;;  %v107_v10 = vcvt.s32.f32 %v91_v7  ;;  %v108_v11 = vcvt.s32.f32 %v92_v8  ;;  %v109_v16 = vcvt.s32.f32 %v93_v14  ;;  %v110_v17 = vcvt.s32.f32 %v94_v15  ;;  %v258_v37 = vld [vmem:[#allocation7 + $0x70] sm:$0xff]  ;;  %v255_v42 = vld [vmem:[#allocation7 + $0x58] sm:$0xff]  ;;  %v253_v46 = vld [vmem:[#allocation7 + $0x48] sm:$0xff] }
  0x1a   :  { %v111_v22 = vcvt.s32.f32 %v95_v20  ;;  %v112_v23 = vcvt.s32.f32 %v96_v21  ;;  %v113_v27 = vcvt.s32.f32 %v97_v25  ;;  %v114_v28 = vcvt.s32.f32 %v98_v26  ;;  %265 = vmatpush.msra.mxu1 %v258_v37  ;;  %v254_v43 = vld [vmem:[#allocation7 + $0x50] sm:$0xff]  ;;  %v252_v47 = vld [vmem:[#allocation7 + $0x40] sm:$0xff]  ;;  %v251_v49 = vld [vmem:[#allocation7 + $0x38] sm:$0xff] }
  0x1b   :  { %v1000_v13 = vpack.c.bf16 %v108_v11, %v107_v10  ;;  %v1003_v18 = vpack.c.bf16 %v110_v17, %v109_v16  ;;  %v99_v32 = vunpack.c.0.s8 %v89_v31  ;;  %v100_v33 = vunpack.c.1.s8 %v89_v31  ;;  %v250_v50 = vld [vmem:[#allocation7 + $0x30] sm:$0xff]  ;;  %v249_v51 = vld [vmem:[#allocation7 + $0x28] sm:$0xff]  ;;  %v90_v52 = vld [vmem:[#allocation2 + $0x18] sm:$0xff] }
  0x1c   :  { %v1006_v24 = vpack.c.bf16 %v112_v23, %v111_v22  ;;  %v1009_v29 = vpack.c.bf16 %v114_v28, %v113_v27  ;;  %266 = vmatpush.msra.mxu1 %v257_v38  ;;  %v101_v40 = vunpack.c.2.s8 %v89_v31  ;;  %v102_v41 = vunpack.c.3.s8 %v89_v31  ;;  %v248_v53 = vld [vmem:[#allocation7 + $0x20] sm:$0xff]  ;;  %v247_v56 = vld [vmem:[#allocation7 + $0x18] sm:$0xff]  ;;  %v246_v57 = vld [vmem:[#allocation7 + $0x10] sm:$0xff] }
  0x1d   :  { %197 = vmatpush.bf16.msra.mxu0 %v773_v2  ;;  %v115_v34 = vcvt.s32.f32 %v99_v32  ;;  %v116_v35 = vcvt.s32.f32 %v100_v33  ;;  %v103_v54 = vunpack.c.0.s8 %v90_v52  ;;  %v104_v55 = vunpack.c.1.s8 %v90_v52  ;;  %v245_v60 = vld [vmem:[#allocation7 + $0x8] sm:$0xff]  ;;  %v244_v62 = vld [vmem:[#allocation7] sm:$0xff]  ;;  %v360_v14 = vld [vmem:[#allocation8 + $0x78] sm:$0xff] }
  0x1e   :  { %267 = vmatpush.msra.mxu1 %v256_v39  ;;  %v117_v44 = vcvt.s32.f32 %v101_v40  ;;  %v118_v45 = vcvt.s32.f32 %v102_v41  ;;  %v105_v63 = vunpack.c.2.s8 %v90_v52  ;;  %v106_v0 = vunpack.c.3.s8 %v90_v52  ;;  %v359_v15 = vld [vmem:[#allocation8 + $0x70] sm:$0xff]  ;;  %361 = vmatpush.msra.mxu2 %v360_v14  ;;  %v358_v16 = vld [vmem:[#allocation8 + $0x68] sm:$0xff]  ;;  %v357_v19 = vld [vmem:[#allocation8 + $0x60] sm:$0xff] }
  0x1f   :  { %v1012_v36 = vpack.c.bf16 %v116_v35, %v115_v34  ;;  %v119_v58 = vcvt.s32.f32 %v103_v54  ;;  %v120_v59 = vcvt.s32.f32 %v104_v55  ;;  %v356_v20 = vld [vmem:[#allocation8 + $0x58] sm:$0xff]  ;;  %v355_v21 = vld [vmem:[#allocation8 + $0x50] sm:$0xff]  ;;  %v354_v22 = vld [vmem:[#allocation8 + $0x48] sm:$0xff] }
  0x20   :  { %268 = vmatpush.msra.mxu1 %v255_v42  ;;  %v1015_v48 = vpack.c.bf16 %v118_v45, %v117_v44  ;;  %v121_v1 = vcvt.s32.f32 %v105_v63  ;;  %v122_v2 = vcvt.s32.f32 %v106_v0  ;;  %362 = vmatpush.msra.mxu2 %v359_v15  ;;  %v353_v25 = vld [vmem:[#allocation8 + $0x40] sm:$0xff]  ;;  %v352_v26 = vld [vmem:[#allocation8 + $0x38] sm:$0xff]  ;;  %v351_v27 = vld [vmem:[#allocation8 + $0x30] sm:$0xff] }
  0x21   :  { %198 = vmatpush.bf16.msra.mxu0 %v772_v3  ;;  %v1018_v61 = vpack.c.bf16 %v120_v59, %v119_v58  ;;  %v350_v28 = vld [vmem:[#allocation8 + $0x28] sm:$0xff]  ;;  %v349_v31 = vld [vmem:[#allocation8 + $0x20] sm:$0xff]  ;;  %v348_v32 = vld [vmem:[#allocation8 + $0x18] sm:$0xff] }
  0x22   :  { %269 = vmatpush.msra.mxu1 %v254_v43  ;;  %v1021_v3 = vpack.c.bf16 %v122_v2, %v121_v1  ;;  %363 = vmatpush.msra.mxu2 %v358_v16  ;;  %v347_v33 = vld [vmem:[#allocation8 + $0x10] sm:$0xff]  ;;  %v346_v34 = vld [vmem:[#allocation8 + $0x8] sm:$0xff]  ;;  %v345_v37 = vld [vmem:[#allocation8] sm:$0xff] }
  0x23   :  { %v797_v41 = vld [vmem:[%s1100_s3] ss:$0 sm:$0xff] }
  0x24   :  { %270 = vmatpush.msra.mxu1 %v253_v46  ;;  %364 = vmatpush.msra.mxu2 %v357_v19 }
  0x25   :  { %199 = vmatpush.bf16.msra.mxu0 %v771_v4 }
  0x26   :  { %271 = vmatpush.msra.mxu1 %v252_v47  ;;  %365 = vmatpush.msra.mxu2 %v356_v20 }
  0x28   :  { %272 = vmatpush.msra.mxu1 %v251_v49  ;;  %366 = vmatpush.msra.mxu2 %v355_v21 }
  0x29   :  { %200 = vmatpush.bf16.msra.mxu0 %v770_v5 }
  0x2a   :  { %273 = vmatpush.msra.mxu1 %v250_v50  ;;  %367 = vmatpush.msra.mxu2 %v354_v22 }
  0x2c   :  { %274 = vmatpush.msra.mxu1 %v249_v51  ;;  %368 = vmatpush.msra.mxu2 %v353_v25 }
  0x2d   :  { %201 = vmatpush.bf16.msra.mxu0 %v769_v9 }
  0x2e   :  { %275 = vmatpush.msra.mxu1 %v248_v53  ;;  %369 = vmatpush.msra.mxu2 %v352_v26 }
  0x30   :  { %276 = vmatpush.msra.mxu1 %v247_v56  ;;  %370 = vmatpush.msra.mxu2 %v351_v27 }
  0x31   :  { %202 = vmatpush.bf16.msra.mxu0 %v768_v12 }
  0x32   :  { %277 = vmatpush.msra.mxu1 %v246_v57  ;;  %371 = vmatpush.msra.mxu2 %v350_v28 }
  0x34   :  { %203 = vmatmul.bf16.vlgmr.msra.gmra.mxu0 %v1000_v13  ;;  %278 = vmatpush.msra.mxu1 %v245_v60 }
  0x35   :  { %372 = vmatpush.msra.mxu2 %v349_v31 }
  0x36   :  { %279 = vmatpush.msra.mxu1 %v244_v62 }
  0x37   :  { %373 = vmatpush.msra.mxu2 %v348_v32 }
  0x39   :  { %374 = vmatpush.msra.mxu2 %v347_v33 }
  0x3b   :  { %375 = vmatpush.msra.mxu2 %v346_v34 }
  0x3d   :  { %376 = vmatpush.msra.mxu2 %v345_v37 }
  0x44   :  { %208 = vmatmul.bf16.gmra.mxu0 %v1003_v18 }
  0x54   :  { %213 = vmatmul.bf16.gmra.mxu0 %v1006_v24 }
  0x64   :  { %218 = vmatmul.bf16.gmra.mxu0 %v1009_v29 }
  0x74   :  { %223 = vmatmul.bf16.gmra.mxu0 %v1012_v36 }
  0x84   :  { %228 = vmatmul.bf16.gmra.mxu0 %v1015_v48 }
  0x94   :  { %233 = vmatmul.bf16.gmra.mxu0 %v1018_v61 }
  0xa4   :  { %238 = vmatmul.bf16.gmra.mxu0 %v1021_v3 }
  0xb1   :  { %v204_v4 = vpop.f32.mrf.mxu0 }
  0xb2   :  { %280 = vmatmul.f32.vlgmr.msra.gmra.mxu1 %v204_v4 }
  0xb9   :  { %v206_v5 = vpop.f32.mrf.mxu0 }
  0xba   :  { %283 = vmatmul.f32.gmra.mxu1 %v206_v5 }
  0xc1   :  { %v209_v6 = vpop.f32.mrf.mxu0 }
  0xc2   :  { %286 = vmatmul.f32.gmra.mxu1 %v209_v6 }
  0xc9   :  { %v211_v7 = vpop.f32.mrf.mxu0 }
  0xca   :  { %289 = vmatmul.f32.gmra.mxu1 %v211_v7 }
  0xd1   :  { %v214_v8 = vpop.f32.mrf.mxu0 }
  0xd2   :  { %292 = vmatmul.f32.gmra.mxu1 %v214_v8 }
  0xd9   :  { %v216_v9 = vpop.f32.mrf.mxu0 }
  0xda   :  { %295 = vmatmul.f32.gmra.mxu1 %v216_v9 }
  0xe1   :  { %v219_v10 = vpop.f32.mrf.mxu0 }
  0xe2   :  { %298 = vmatmul.f32.gmra.mxu1 %v219_v10 }
  0xe9   :  { %v221_v11 = vpop.f32.mrf.mxu0 }
  0xea   :  { %301 = vmatmul.f32.gmra.mxu1 %v221_v11 }
  0xf1   :  { %v224_v12 = vpop.f32.mrf.mxu0 }
  0xf2   :  { %304 = vmatmul.f32.gmra.mxu1 %v224_v12 }
  0xf9   :  { %v226_v17 = vpop.f32.mrf.mxu0 }
  0xfa   :  { %307 = vmatmul.f32.gmra.mxu1 %v226_v17 }
 0x101   :  { %v229_v23 = vpop.f32.mrf.mxu0 }
 0x102   :  { %310 = vmatmul.f32.gmra.mxu1 %v229_v23 }
 0x109   :  { %v231_v30 = vpop.f32.mrf.mxu0 }
 0x10a   :  { %313 = vmatmul.f32.gmra.mxu1 %v231_v30 }
 0x111   :  { %v234_v35 = vpop.f32.mrf.mxu0 }
 0x112   :  { %316 = vmatmul.f32.gmra.mxu1 %v234_v35 }
 0x119   :  { %v236_v38 = vpop.f32.mrf.mxu0 }
 0x11a   :  { %319 = vmatmul.f32.gmra.mxu1 %v236_v38 }
 0x121   :  { %v239_v39 = vpop.f32.mrf.mxu0 }
 0x122   :  { %322 = vmatmul.f32.gmra.mxu1 %v239_v39 }
 0x129   :  { %v241_v40 = vpop.f32.mrf.mxu0 }
 0x12a   :  { %325 = vmatmul.f32.gmra.mxu1 %v241_v40 }
 0x12f   :  { %v281_v42 = vpop.f32.mrf.mxu1 }
 0x130   :  { %v282_v43 = vadd.f32 %v797_v41, %v281_v42 }
 0x132   :  { %v329_v44 = vmax.f32 %v282_v43, 0.0 }
 0x134   :  { %377 = vmatmul.f32.vlgmr.msra.gmra.mxu2 %v329_v44 }
 0x137   :  { %v284_v45 = vpop.f32.mrf.mxu1 }
 0x138   :  { %v285_v46 = vadd.f32 %v797_v41, %v284_v45 }
 0x13a   :  { %v330_v47 = vmax.f32 %v285_v46, 0.0 }
 0x13c   :  { %380 = vmatmul.f32.gmra.mxu2 %v330_v47 }
 0x13f   :  { %v287_v49 = vpop.f32.mrf.mxu1 }
 0x140   :  { %v288_v50 = vadd.f32 %v797_v41, %v287_v49 }
 0x142   :  { %v331_v51 = vmax.f32 %v288_v50, 0.0 }
 0x144   :  { %383 = vmatmul.f32.gmra.mxu2 %v331_v51 }
 0x147   :  { %v290_v52 = vpop.f32.mrf.mxu1 }
 0x148   :  { %v291_v53 = vadd.f32 %v797_v41, %v290_v52 }
 0x14a   :  { %v332_v54 = vmax.f32 %v291_v53, 0.0 }
 0x14c   :  { %386 = vmatmul.f32.gmra.mxu2 %v332_v54 }
 0x14f   :  { %v293_v55 = vpop.f32.mrf.mxu1 }
 0x150   :  { %v294_v56 = vadd.f32 %v797_v41, %v293_v55 }
 0x152   :  { %v333_v57 = vmax.f32 %v294_v56, 0.0 }
 0x154   :  { %389 = vmatmul.f32.gmra.mxu2 %v333_v57 }
 0x157   :  { %v296_v58 = vpop.f32.mrf.mxu1 }
 0x158   :  { %v297_v59 = vadd.f32 %v797_v41, %v296_v58 }
 0x15a   :  { %v334_v60 = vmax.f32 %v297_v59, 0.0  ;;  %v504_v59 = vlaneseq }
 0x15c   :  { %392 = vmatmul.f32.gmra.mxu2 %v334_v60  ;;  %v505_v60 = vand.u32 127, %v504_v59 }
 0x15e   :  { %vm522_vm0 = vcmp.lt.s32.totalorder %v505_v60, 24 }
 0x15f   :  { %v299_v62 = vpop.f32.mrf.mxu1 }
 0x160   :  { %v300_v63 = vadd.f32 %v797_v41, %v299_v62 }
 0x162   :  { %v335_v0 = vmax.f32 %v300_v63, 0.0 }
 0x164   :  { %395 = vmatmul.f32.gmra.mxu2 %v335_v0 }
 0x167   :  { %v302_v1 = vpop.f32.mrf.mxu1 }
 0x168   :  { %v303_v2 = vadd.f32 %v797_v41, %v302_v1 }
 0x16a   :  { %v336_v4 = vmax.f32 %v303_v2, 0.0 }
 0x16c   :  { %398 = vmatmul.f32.gmra.mxu2 %v336_v4 }
 0x16f   :  { %v305_v5 = vpop.f32.mrf.mxu1 }
 0x170   :  { %v306_v6 = vadd.f32 %v797_v41, %v305_v5 }
 0x172   :  { %v337_v7 = vmax.f32 %v306_v6, 0.0 }
 0x174   :  { %401 = vmatmul.f32.gmra.mxu2 %v337_v7 }
 0x177   :  { %v308_v8 = vpop.f32.mrf.mxu1 }
 0x178   :  { %v309_v9 = vadd.f32 %v797_v41, %v308_v8 }
 0x17a   :  { %v338_v10 = vmax.f32 %v309_v9, 0.0 }
 0x17c   :  { %404 = vmatmul.f32.gmra.mxu2 %v338_v10 }
 0x17f   :  { %v311_v11 = vpop.f32.mrf.mxu1 }
 0x180   :  { %v312_v12 = vadd.f32 %v797_v41, %v311_v11 }
 0x182   :  { %v339_v14 = vmax.f32 %v312_v12, 0.0 }
 0x184   :  { %407 = vmatmul.f32.gmra.mxu2 %v339_v14 }
 0x187   :  { %v314_v15 = vpop.f32.mrf.mxu1 }
 0x188   :  { %v315_v16 = vadd.f32 %v797_v41, %v314_v15 }
 0x18a   :  { %v340_v17 = vmax.f32 %v315_v16, 0.0 }
 0x18c   :  { %410 = vmatmul.f32.gmra.mxu2 %v340_v17 }
 0x18f   :  { %v317_v19 = vpop.f32.mrf.mxu1 }
 0x190   :  { %v318_v20 = vadd.f32 %v797_v41, %v317_v19 }
 0x192   :  { %v341_v21 = vmax.f32 %v318_v20, 0.0 }
 0x194   :  { %413 = vmatmul.f32.gmra.mxu2 %v341_v21 }
 0x197   :  { %v320_v22 = vpop.f32.mrf.mxu1 }
 0x198   :  { %v321_v23 = vadd.f32 %v797_v41, %v320_v22 }
 0x19a   :  { %v342_v25 = vmax.f32 %v321_v23, 0.0 }
 0x19c   :  { %416 = vmatmul.f32.gmra.mxu2 %v342_v25 }
 0x19f   :  { %v323_v26 = vpop.f32.mrf.mxu1 }
 0x1a0   :  { %v324_v27 = vadd.f32 %v797_v41, %v323_v26 }
 0x1a2   :  { %v343_v28 = vmax.f32 %v324_v27, 0.0 }
 0x1a4   :  { %419 = vmatmul.f32.gmra.mxu2 %v343_v28 }
 0x1a7   :  { %v326_v30 = vpop.f32.mrf.mxu1 }
 0x1a8   :  { %v327_v31 = vadd.f32 %v797_v41, %v326_v30 }
 0x1aa   :  { %v344_v32 = vmax.f32 %v327_v31, 0.0 }
 0x1ac   :  { %422 = vmatmul.f32.gmra.mxu2 %v344_v32  ;;  %v942_v32 = vmov 191.0  }
 0x1b7   :  { %v378_v33 = vpop.f32.mrf.mxu2 }
 0x1bf   :  { %v381_v34 = vpop.f32.mrf.mxu2 }
 0x1c0   :  { %v426_v35 = vpack.c.bf16 %v381_v34, %v378_v33 }
 0x1c7   :  { %v384_v37 = vpop.f32.mrf.mxu2 }
 0x1cf   :  { %v387_v38 = vpop.f32.mrf.mxu2 }
 0x1d0   :  { %v427_v39 = vpack.c.bf16 %v387_v38, %v384_v37 }
 0x1d7   :  { %v390_v40 = vpop.f32.mrf.mxu2 }
 0x1df   :  { %v393_v42 = vpop.f32.mrf.mxu2 }
 0x1e0   :  { %v428_v43 = vpack.c.bf16 %v393_v42, %v390_v40 }
 0x1e7   :  { %v396_v44 = vpop.f32.mrf.mxu2 }
 0x1ef   :  { %v399_v45 = vpop.f32.mrf.mxu2 }
 0x1f0   :  { %v429_v46 = vpack.c.bf16 %v399_v45, %v396_v44 }
 0x1f7   :  { %v402_v47 = vpop.f32.mrf.mxu2 }
 0x1ff   :  { %v405_v49 = vpop.f32.mrf.mxu2 }
 0x200   :  { %v430_v58 = vpack.c.bf16 %v405_v49, %v402_v47 }
 0x207   :  { %v408_v50 = vpop.f32.mrf.mxu2 }
 0x20f   :  { %v411_v51 = vpop.f32.mrf.mxu2 }
 0x210   :  { %v431_v57 = vpack.c.bf16 %v411_v51, %v408_v50 }
 0x217   :  { %v414_v52 = vpop.f32.mrf.mxu2 }
 0x21f   :  { %v417_v41 = vpop.f32.mrf.mxu2 }
 0x220   :  { %v432_v56 = vpack.c.bf16 %v417_v41, %v414_v52 }
 0x227   :  { %v420_v53 = vpop.f32.mrf.mxu2 }
 0x22f   :  { %v423_v54 = vpop.f32.mrf.mxu2 }
 0x230   :  { %v433_v55 = vpack.c.bf16 %v423_v54, %v420_v53 }
 0x232   :  { %438 = vmatpush.bf16.msra.mxu3 %v433_v55 }
 0x236   :  { %439 = vmatpush.bf16.msra.mxu3 %v432_v56 }
 0x23a   :  { %440 = vmatpush.bf16.msra.mxu3 %v431_v57 }
 0x23e   :  { %441 = vmatpush.bf16.msra.mxu3 %v430_v58 }
 0x242   :  { %442 = vmatpush.bf16.msra.mxu3 %v429_v46 }
 0x246   :  { %443 = vmatpush.bf16.msra.mxu3 %v428_v43 }
 0x24a   :  { %444 = vmatpush.bf16.msra.mxu3 %v427_v39 }
 0x24e   :  { %445 = vmatpush.bf16.msra.mxu3 %v426_v35 }
 0x251   :  { %446 = vmatmul.bf16.vlgmr.msra.gmra.mxu3 %v1000_v13  ;;  %v1038_v13 = vld [vmem:[%s1102_s5] ss:$0 sm:$0xff] }
 0x261   :  { %451 = vmatmul.bf16.gmra.mxu3 %v1003_v18 }
 0x271   :  { %456 = vmatmul.bf16.gmra.mxu3 %v1006_v24 }
 0x281   :  { %461 = vmatmul.bf16.gmra.mxu3 %v1009_v29 }
 0x291   :  { %466 = vmatmul.bf16.gmra.mxu3 %v1012_v36  ;;  %v941_v36 = vmov 192.0  }
 0x292   :  { %799 = vrcp.f32 %v941_v36 }
 0x293   :  { %801 = vrcp.f32 %v942_v32 }
 0x2a1   :  { %471 = vmatmul.bf16.gmra.mxu3 %v1015_v48  ;;  %v800_v48 = vpop.eup %799 }
 0x2a2   :  { %vm584_vm1 = vweird.f32 %v800_v48  ;;  %v802_v33 = vpop.eup %801 }
 0x2a3   :  { %v662_v34 = vmul.f32 191.0, %v802_v33  ;;  %vm666_vm2 = vweird.f32 %v802_v33 }
 0x2a5   :  { %v663_v35 = vsub.f32 1.0, %v662_v34 }
 0x2a7   :  { %v664_v40 = vmul.f32 %v802_v33, %v663_v35 }
 0x2a9   :  { %v665_v44 = vadd.f32 %v802_v33, %v664_v40 }
 0x2ab   :  { %v667_v47 = vsel %vm666_vm2, %v802_v33, %v665_v44 }
 0x2b1   :  { %476 = vmatmul.bf16.gmra.mxu3 %v1018_v61  ;;  %v580_v61 = vmul.f32 192.0, %v800_v48 }
 0x2b3   :  { %v581_v62 = vsub.f32 1.0, %v580_v61 }
 0x2b5   :  { %v582_v1 = vmul.f32 %v800_v48, %v581_v62 }
 0x2b7   :  { %v583_v5 = vadd.f32 %v800_v48, %v582_v1 }
 0x2b9   :  { %v585_v8 = vsel %vm584_vm1, %v800_v48, %v583_v5 }
 0x2c1   :  { %481 = vmatmul.bf16.gmra.mxu3 %v1021_v3 }
 0x2d4   :  { %v447_v18 = vpop.f32.mrf.mxu3 }
 0x2d5   :  { %v448_v24 = vadd.f32 %v1038_v13, %v447_v18 }
 0x2d7   :  { %v539_v29 = vsel %vm522_vm0, %v448_v24, 0.0 }
 0x2d8   :  { %570 = vadd.xlane.f32.xlu0 %v539_v29 }
 0x2dc   :  { %v449_v9 = vpop.f32.mrf.mxu3 }
 0x2dd   :  { %v450_v20 = vadd.f32 %v1038_v13, %v449_v9 }
 0x2e4   :  { %v452_v10 = vpop.f32.mrf.mxu3 }
 0x2e5   :  { %v1043_v14 = vadd.f32 %v1038_v13, %v452_v10 }
 0x2ec   :  { %v454_v11 = vpop.f32.mrf.mxu3 }
 0x2ed   :  { %v1046_v15 = vadd.f32 %v1038_v13, %v454_v11 }
 0x2f4   :  { %v457_v12 = vpop.f32.mrf.mxu3 }
 0x2f5   :  { %v1049_v16 = vadd.f32 %v1038_v13, %v457_v12 }
 0x2fc   :  { %v459_v17 = vpop.f32.mrf.mxu3 }
 0x2fd   :  { %v1052_v19 = vadd.f32 %v1038_v13, %v459_v17 }
 0x304   :  { %v462_v49 = vpop.f32.mrf.mxu3 }
 0x305   :  { %v463_v48 = vadd.f32 %v1038_v13, %v462_v49 }
 0x30c   :  { %v464_v50 = vpop.f32.mrf.mxu3 }
 0x30d   :  { %v465_v61 = vadd.f32 %v1038_v13, %v464_v50 }
 0x314   :  { %v467_v52 = vpop.f32.mrf.mxu3 }
 0x31c   :  { %v469_v56 = vpop.f32.mrf.mxu3 }
 0x324   :  { %v472_v60 = vpop.f32.mrf.mxu3 }
 0x325   :  { %v473_v5 = vadd.f32 %v1038_v13, %v472_v60 }
 0x32c   :  { %v474_v18 = vpop.f32.mrf.mxu3 }
 0x34b   :  { %v571_v3 = vpop.xlane.xlu0 %570 }
 0x34c   :  { %v572_v63 = vrot.slane %v571_v3, 4 }
 0x34e   :  { %v573_v0 = vadd.f32 %v572_v63, %v571_v3  ;;  %v468_v3 = vadd.f32 %v1038_v13, %v467_v52 }
 0x350   :  { %v574_v2 = vrot.slane %v573_v0, 2 }
 0x352   :  { %v575_v4 = vadd.f32 %v574_v2, %v573_v0  ;;  %v470_v2 = vadd.f32 %v1038_v13, %v469_v56 }
 0x354   :  { %v576_v6 = vrot.slane %v575_v4, 1 }
 0x356   :  { %v577_v7 = vadd.f32 %v576_v6, %v575_v4 }
 0x358   :  { %776 = vpush %v577_v7 }
 0x359   :  { %778 = vpush %v585_v8  ;;  %v475_v8 = vadd.f32 %v1038_v13, %v474_v18 }
 0x389   :  { %s777_s5 = spop %776 }
 0x38a   :  { %s779_s20 = spop %778 }
 0x38b   :  { %s587_s21 = smul.f32 %s779_s20, %s777_s5 }
 0x38d   :  { %v1055_v21 = vstv %s587_s21 }
 0x38e   :  { %v590_v22 = vsub.f32 %v450_v20, %v1055_v21  ;;  %v591_v23 = vsub.f32 %v1043_v14, %v1055_v21  ;;  %v592_v25 = vsub.f32 %v1046_v15, %v1055_v21  ;;  %v593_v26 = vsub.f32 %v1049_v16, %v1055_v21 }
 0x38f   :  { %v594_v27 = vsub.f32 %v1052_v19, %v1055_v21  ;;  %v589_v28 = vsub.f32 %v448_v24, %v1055_v21  ;;  %v477_v24 = vpop.f32.mrf.mxu3  ;;  %v595_v6 = vsub.f32 %v463_v48, %v1055_v21  ;;  %v596_v9 = vsub.f32 %v465_v61, %v1055_v21 }
 0x390   :  { %v478_v11 = vadd.f32 %v1038_v13, %v477_v24  ;;  %v597_v12 = vsub.f32 %v468_v3, %v1055_v21  ;;  %v598_v17 = vsub.f32 %v470_v2, %v1055_v21 }
 0x391   :  { %v605_v30 = vsel %vm522_vm0, %v589_v28, 0.0 }
 0x392   :  { %v621_v31 = vmul.f32 %v605_v30, %v605_v30 }
 0x394   :  { %652 = vadd.xlane.f32.xlu0 %v621_v31 }
 0x397   :  { %v479_v29 = vpop.f32.mrf.mxu3 }
 0x398   :  { %v480_v16 = vadd.f32 %v1038_v13, %v479_v29 }
 0x39a   :  { %v602_v31 = vsub.f32 %v480_v16, %v1055_v21 }
 0x39f   :  { %v482_v36 = vpop.f32.mrf.mxu3 }
 0x3a7   :  { %v484_v14 = vpop.f32.mrf.mxu3 }
 0x407   :  { %v653_v37 = vpop.xlane.xlu0 %652 }
 0x408   :  { %v654_v38 = vrot.slane %v653_v37, 4 }
 0x40a   :  { %v655_v39 = vadd.f32 %v654_v38, %v653_v37 }
 0x40c   :  { %v656_v42 = vrot.slane %v655_v39, 2 }
 0x40e   :  { %v657_v43 = vadd.f32 %v656_v42, %v655_v39 }
 0x410   :  { %v658_v45 = vrot.slane %v657_v43, 1 }
 0x412   :  { %v659_v46 = vadd.f32 %v658_v45, %v657_v43 }
 0x414   :  { %780 = vpush %v659_v46 }
 0x415   :  { %782 = vpush %v667_v47 }
 0x445   :  { %s781_s22 = spop %780 }
 0x446   :  { %s783_s23 = spop %782 }
 0x447   :  { %s669_s24 = smul.f32 %s783_s23, %s781_s22 }
 0x449   :  { %v670_v51 = vstv %s669_s24 }
 0x44a   :  { %803 = vrsqrt.f32 %v670_v51  ;;  %vm677_vm4 = vweird.f32 %v670_v51 }
 0x450   :  { %v804_v41 = vpop.eup %803 }
 0x451   :  { %v672_v53 = vmul.f32 %v804_v41, %v670_v51  ;;  %vm678_vm3 = vweird.f32 %v804_v41 }
 0x452   :  { %vm679_vm5 = vmor %vm677_vm4, %vm678_vm3 }
 0x453   :  { %v673_v54 = vmul.f32 %v804_v41, %v672_v53 }
 0x455   :  { %v674_v55 = vmul.f32 0.5, %v673_v54 }
 0x457   :  { %v675_v57 = vsub.f32 1.5, %v674_v55 }
 0x459   :  { %v676_v58 = vmul.f32 %v804_v41, %v675_v57 }
 0x45b   :  { %v680_v59 = vsel %vm679_vm5, %v804_v41, %v676_v58 }
 0x45c   :  { %784 = vpush %v680_v59 }
 0x48d   :  { %s785_s25 = spop %784 }
 0x48e   :  { %v682_v62 = vstv %s785_s25 }
 0x48f   :  { %v683_v63 = vmul.f32 %v682_v62, %v589_v28  ;;  %v684_v0 = vmul.f32 %v682_v62, %v590_v22  ;;  %v685_v1 = vmul.f32 %v682_v62, %v591_v23  ;;  %v686_v4 = vmul.f32 %v682_v62, %v592_v25 }
 0x490   :  { %v687_v7 = vmul.f32 %v682_v62, %v593_v26  ;;  %v688_v10 = vmul.f32 %v682_v62, %v594_v27  ;;  %v689_v15 = vmul.f32 %v682_v62, %v595_v6  ;;  %v690_v20 = vmul.f32 %v682_v62, %v596_v9 }
 0x491   :  { %699 = vst [vmem:[#allocation10] sm:$0xff] %v683_v63  ;;  %v483_v22 = vadd.f32 %v1038_v13, %v482_v36  ;;  %v599_v23 = vsub.f32 %v473_v5, %v1055_v21  ;;  %v691_v19 = vmul.f32 %v682_v62, %v597_v12  ;;  %v600_v25 = vsub.f32 %v475_v8, %v1055_v21 }
 0x492   :  { %700 = vst [vmem:[#allocation10 + $0x8] sm:$0xff] %v684_v0  ;;  %v485_v26 = vadd.f32 %v1038_v13, %v484_v14  ;;  %v692_v27 = vmul.f32 %v682_v62, %v598_v17  ;;  %v601_v28 = vsub.f32 %v478_v11, %v1055_v21  ;;  %v696_v37 = vmul.f32 %v682_v62, %v602_v31 }
 0x493   :  { %701 = vst [vmem:[#allocation10 + $0x10] sm:$0xff] %v685_v1  ;;  %v693_v30 = vmul.f32 %v682_v62, %v599_v23  ;;  %v694_v32 = vmul.f32 %v682_v62, %v600_v25  ;;  %v603_v33 = vsub.f32 %v483_v22, %v1055_v21 }
 0x494   :  { %702 = vst [vmem:[#allocation10 + $0x18] sm:$0xff] %v686_v4  ;;  %v695_v34 = vmul.f32 %v682_v62, %v601_v28  ;;  %v604_v35 = vsub.f32 %v485_v26, %v1055_v21 }
 0x495   :  { %703 = vst [vmem:[#allocation10 + $0x20] sm:$0xff] %v687_v7  ;;  %v697_v38 = vmul.f32 %v682_v62, %v603_v33 }
 0x496   :  { %704 = vst [vmem:[#allocation10 + $0x28] sm:$0xff] %v688_v10  ;;  %v698_v13 = vmul.f32 %v682_v62, %v604_v35 }
 0x497   :  { %705 = vst [vmem:[#allocation10 + $0x30] sm:$0xff] %v689_v15 }
 0x498   :  { %706 = vst [vmem:[#allocation10 + $0x38] sm:$0xff] %v690_v20 }
 0x499   :  { %707 = vst [vmem:[#allocation10 + $0x40] sm:$0xff] %v691_v19 }
 0x49a   :  { %708 = vst [vmem:[#allocation10 + $0x48] sm:$0xff] %v692_v27 }
 0x49b   :  { %709 = vst [vmem:[#allocation10 + $0x50] sm:$0xff] %v693_v30 }
 0x49c   :  { %710 = vst [vmem:[#allocation10 + $0x58] sm:$0xff] %v694_v32 }
 0x49d   :  { %711 = vst [vmem:[#allocation10 + $0x60] sm:$0xff] %v695_v34 }
 0x49e   :  { %712 = vst [vmem:[#allocation10 + $0x68] sm:$0xff] %v696_v37 }
 0x49f   :  { %713 = vst [vmem:[#allocation10 + $0x70] sm:$0xff] %v697_v38 }
 0x4a0   :  { %714 = vst [vmem:[#allocation10 + $0x78] sm:$0xff] %v698_v13 }
 0x4a1   :  { %727 = dma.vmem_to_hbm [thread:$0]  %s720_s27, 2048, %s722_s30, [#allocation4], %s937_s9, %s937_s9, %s938_s10  }
 0x4a2   :  { %931 = dma.done.wait [#allocation4], 2048  }
 0x4a3   :  { %932 = vsyncadd [#allocation4], 4294965248 }
 0x4a4   :  { %732 = vsyncpa [#allocation3], 1 }
 0x4a5   :  { %733 = vsyncpa [#allocation6], 1 }
 0x4a6   :  { %734 = vsyncpa [#allocation9], 1 }
 0x4a7   :  { %735 = vsyncpa [#allocation4], 1 }

</bundles_post_ra>
